<compile_context>
chip_gen: v6e
topology: v6e:2x2x1
jax: 0.10.0
libtpu: 0.0.40
codegen_flags: <defaults>
</compile_context>

<pallas_src>
import functools
import math

import jax
import jax.numpy as jnp
from jax.experimental import pallas as pl
from jax.experimental.pallas import tpu as pltpu


def _round_up(x, m):
    return ((x + m - 1) // m) * m


def _skate_kernel(pe_ref, m_ref, o_ref):
    # pe_ref: (tm, D)    time-embedding rows (zero rows for padded frames)
    # m_ref:  (D, V*D)   skeleton embedding folded into a block-diag replication
    # o_ref:  (tm, V*D)  lane-dense output rows
    o_ref[...] = jnp.dot(
        pe_ref[...],
        m_ref[...],
        preferred_element_type=jnp.float32,
        precision=jax.lax.Precision.HIGHEST,
    ).astype(o_ref.dtype)


def make_time_embed(max_frames, d_model, dtype=jnp.float32):
    """Fixed sinusoidal time embedding buffer, matching the PyTorch registration."""
    position = jnp.arange(max_frames, dtype=jnp.float32)[:, None]
    div_term = jnp.exp(
        jnp.arange(0, d_model, 2, dtype=jnp.float32) * (-math.log(10000.0) / d_model)
    )
    angles = position * div_term                       # (max_frames, d_model // 2)
    pe = jnp.zeros((max_frames, d_model), jnp.float32)
    pe = pe.at[:, 0::2].set(jnp.sin(angles))
    pe = pe.at[:, 1::2].set(jnp.cos(angles))
    return pe.astype(dtype)


def init_skel_embed(key, num_joints, d_model, std=0.02, dtype=jnp.float32):
    # Matches nn.init.trunc_normal_(std=0.02) (truncation at +/- 2 sigma).
    return (
        jax.random.truncated_normal(key, -2.0, 2.0, (num_joints, d_model)) * std
    ).astype(dtype)


@functools.partial(jax.jit, static_argnames=("T", "V", "tm"))
def skate_embedding(skel_embed, time_embed, T, V, *, tm=1024):
    """Returns [T, V, d_model] with SkateEmbedding.forward(B, T, V) semantics."""
    num_joints, d_model = skel_embed.shape
    max_frames = time_embed.shape[0]
    assert V == num_joints, "V must equal num_joints (required by the torch concat)"
    D = d_model
    VD = V * D
    dtype = skel_embed.dtype

    # --- row (time) tile: big, multiple of 8, VMEM-bounded; never the whole array.
    bytes_per_out_row = VD * jnp.dtype(dtype).itemsize
    tm_cap = max(8, (4 * 1024 * 1024 // max(bytes_per_out_row, 1)) // 8 * 8)
    tm_req = _round_up(max(int(tm), 8), 8)
    tm_eff = max(8, min(tm_req, tm_cap, _round_up(T, 8)))
    T_pad = _round_up(T, tm_eff)

    # --- time part: slice to min(T, max_frames), zero-pad to T_pad rows.
    #     Zero rows reproduce the module's zero padding for t >= max_frames.
    T_used = min(T, max_frames)
    pe = time_embed[:T_used].astype(dtype)                  # (T_used, D)
    pe_full = jnp.pad(pe, ((0, T_pad - T_used), (0, 0)))    # (T_pad, D)

    # --- fold the skeleton embedding into a (D, V*D) block-diagonal matrix so the
    #     outer product becomes one lane-dense MXU matmul:
    #       M[d, v*D + d'] = skel[v, d] * (d == d')
    M = (
        jnp.eye(D, dtype=dtype)[:, None, :]
        * jnp.transpose(skel_embed)[:, :, None]
    ).reshape(D, VD)

    grid = (T_pad // tm_eff,)
    out2d = pl.pallas_call(
        _skate_kernel,
        out_shape=jax.ShapeDtypeStruct((T_pad, VD), dtype),
        grid_spec=pltpu.PrefetchScalarGridSpec(
            num_scalar_prefetch=0,
            grid=grid,
            in_specs=[
                pl.BlockSpec((tm_eff, D), lambda i: (i, 0)),   # time-row tile
                pl.BlockSpec((D, VD), lambda i: (0, 0)),       # folded skel, reused
            ],
            out_specs=pl.BlockSpec((tm_eff, VD), lambda i: (i, 0)),
        ),
        compiler_params=pltpu.CompilerParams(
            dimension_semantics=("parallel",),
        ),
    )(pe_full, M)

    if T_pad != T:
        out2d = out2d[:T]
    return out2d.reshape(T, V, D)


def _reference(skel_embed, time_embed, T, V):
    """Pure-JAX mirror of the PyTorch forward."""
    max_frames, d_model = time_embed.shape
    T_used = min(T, max_frames)
    emb = time_embed[:T_used, None, :] * skel_embed[None, :, :]
    if T_used < T:
        pad = jnp.zeros((T - T_used, V, d_model), emb.dtype)
        emb = jnp.concatenate([emb, pad], axis=0)
    return emb


if __name__ == "__main__":
    # Module config / forward args (small shapes): num_joints=V=16, d_model=32.
    num_joints, d_model, max_frames = 16, 32, 100
    B, T, V = 2, 8, num_joints  # B is unused by the forward, as in the module.

    key = jax.random.PRNGKey(0)
    skel = init_skel_embed(key, num_joints, d_model)
    pe_buf = make_time_embed(max_frames, d_model)

    out = skate_embedding(skel, pe_buf, T, V)
    jax.block_until_ready(out)
    assert out.shape == (T, V, d_model)
    ref = _reference(skel, pe_buf, T, V)
    assert jnp.allclose(out, ref, atol=1e-6, rtol=1e-5)

    # Padding path: T exceeds max_frames -> trailing frames must be zero.
    pe_short = make_time_embed(6, d_model)
    out_pad = skate_embedding(skel, pe_short, T, V)
    jax.block_until_ready(out_pad)
    ref_pad = _reference(skel, pe_short, T, V)
    assert jnp.allclose(out_pad, ref_pad, atol=1e-6, rtol=1e-5)

    print("KERNEL_OK")
</pallas_src>

<mosaic_0001>
module attributes {stable_mosaic.version = 11 : i64} {
  func.func @_skate_kernel(%arg0: i32, %arg1: memref<8x32xf32, #tpu.memory_space<vmem>>, %arg2: memref<32x512xf32, #tpu.memory_space<vmem>>, %arg3: memref<8x512xf32, #tpu.memory_space<vmem>>) attributes {dimension_semantics = [#tpu.dimension_semantics<parallel>], iteration_bounds = array<i64: 1>, scalar_prefetch = 0 : i64, scratch_operands = 0 : i64, tpu.core_type = #tpu.core_type<tc>, window_params = [{transform_indices = @transform_0, window_bounds = array<i64: 8, 32>}, {pipeline_mode = #tpu.pipeline_mode<synchronous>, transform_indices = @transform_1, window_bounds = array<i64: 32, 512>}, {transform_indices = @transform_2, window_bounds = array<i64: 8, 512>}]} {
    %c0 = arith.constant 0 : index
    %c0_0 = arith.constant 0 : index
    %0 = vector.load %arg1[%c0, %c0_0] : memref<8x32xf32, #tpu.memory_space<vmem>>, vector<8x32xf32>
    %c0_1 = arith.constant 0 : index
    %c0_2 = arith.constant 0 : index
    %1 = vector.load %arg2[%c0_1, %c0_2] : memref<32x512xf32, #tpu.memory_space<vmem>>, vector<32x512xf32>
    %cst = arith.constant dense<0.000000e+00> : vector<8x512xf32>
    %2 = tpu.matmul %0, %1, %cst {dimension_numbers = #tpu.dot_dimension_numbers<[1], [0], [0], [1], [0, 0, 1, 1], [], []>, precision = #tpu.contract_precision<fp32>} : vector<8x32xf32>, vector<32x512xf32>, vector<8x512xf32> -> vector<8x512xf32>
    %c0_3 = arith.constant 0 : index
    %c0_4 = arith.constant 0 : index
    %3 = vector.load %arg3[%c0_3, %c0_4] : memref<8x512xf32, #tpu.memory_space<vmem>>, vector<8x512xf32>
    tpu.vector_store %arg3[%c0_3, %c0_4], %2 {strides = array<i32>} : memref<8x512xf32, #tpu.memory_space<vmem>>, vector<8x512xf32>,
    return
  }
  func.func @transform_0(%arg0: i32) -> (i32, i32) {
    %c0_i32 = arith.constant 0 : i32
    %c0_i32_0 = arith.constant 0 : i32
    return %arg0, %c0_i32 : i32, i32
  }
  func.func @transform_1(%arg0: i32) -> (i32, i32) {
    %c0_i32 = arith.constant 0 : i32
    %c0_i32_0 = arith.constant 0 : i32
    %c0_i32_1 = arith.constant 0 : i32
    return %c0_i32, %c0_i32_0 : i32, i32
  }
  func.func @transform_2(%arg0: i32) -> (i32, i32) {
    %c0_i32 = arith.constant 0 : i32
    %c0_i32_0 = arith.constant 0 : i32
    return %arg0, %c0_i32 : i32, i32
  }
}

</mosaic_0001>

<bundles_post_ra>
// kernel: skate_embedding.1
= control target key start
LH: loop header
LB: loop body
LE: loop exit
PB: predicated region body
PF: predicated region fallthrough
CT: control target
= control target key end

     0   :  { %v1127_v3 = vmov 0.0   ;;  %vm28_vm0 = vcmask 261120   ;;  %s1475_s1 = inlined_call_operand.vmem [shape: f32[32,512], index: 1, kind: input, shape index: {}]   ;;  %s1476_s0 = inlined_call_operand.vmem [shape: f32[8,32], index: 0, kind: input, shape index: {}]   ;;  %s1477_s2 = inlined_call_operand.vmem [shape: f32[8,512], index: 2, kind: output, shape index: {}]  }
   0x1   :  { %v25_v0 = vld [vmem:[%s1475_s1 + $0x68] sm:$0xff]  ;;  %v24_v1 = vld [vmem:[%s1475_s1 + $0x60] sm:$0xff]  ;;  %104 = vmatprep.mubr.f32.mxu0 %v1127_v3  ;;  %220 = vmatprep.mubr.f32.mxu1 %v1127_v3  ;;  %v27_v56 = vld [vmem:[%s1475_s1 + $0x78] sm:$0xff] }
   0x2   :  { %v21_v2 = vld [vmem:[%s1475_s1 + $0x48] sm:$0xff]  ;;  %v1154_v4 = vand.u32 4294901760, %v25_v0  ;;  %v1156_v5 = vand.u32 4294901760, %v24_v1  ;;  %v20_v7 = vld [vmem:[%s1475_s1 + $0x40] sm:$0xff]  ;;  %v26_v57 = vld [vmem:[%s1475_s1 + $0x70] sm:$0xff]  ;;  %v1283_v59 = vand.u32 4294901760, %v27_v56 }
   0x3   :  { %v1158_v6 = vand.u32 4294901760, %v21_v2  ;;  %v17_v8 = vld [vmem:[%s1475_s1 + $0x28] sm:$0xff]  ;;  %v16_v9 = vld [vmem:[%s1475_s1 + $0x20] sm:$0xff]  ;;  %v1169_v10 = vand.u32 4294901760, %v20_v7  ;;  %v23_v58 = vld [vmem:[%s1475_s1 + $0x58] sm:$0xff]  ;;  %v1290_v61 = vand.u32 4294901760, %v26_v57 }
   0x4   :  { %v1171_v11 = vand.u32 4294901760, %v17_v8  ;;  %v1173_v12 = vand.u32 4294901760, %v16_v9  ;;  %v13_v13 = vld [vmem:[%s1475_s1 + $0x8] sm:$0xff]  ;;  %v12_v14 = vld [vmem:[%s1475_s1] sm:$0xff]  ;;  %57 = vmatprep.subr.mxu0 %v1154_v4  ;;  %v1188_v17 = vsub.f32 %v25_v0, %v1154_v4  ;;  %v1193_v19 = vsub.f32 %v24_v1, %v1156_v5  ;;  %v22_v60 = vld [vmem:[%s1475_s1 + $0x50] sm:$0xff] }
   0x5   :  { %v11_v15 = vld [vmem:[%s1476_s0] sm:$0xff]  ;;  %v1185_v16 = vand.u32 4294901760, %v13_v13  ;;  %v1190_v18 = vand.u32 4294901760, %v12_v14  ;;  %59 = vmatpush1.msra.mxu0 %v1156_v5  ;;  %v1197_v20 = vsub.f32 %v21_v2, %v1158_v6  ;;  %v1201_v22 = vsub.f32 %v20_v7, %v1169_v10  ;;  %v19_v62 = vld [vmem:[%s1475_s1 + $0x38] sm:$0xff]  ;;  %v18_v0 = vld [vmem:[%s1475_s1 + $0x30] sm:$0xff] }
   0x6   :  { %v30_v21 = vsel %vm28_vm0, %v11_v15, 0  ;;  %v1204_v23 = vsub.f32 %v17_v8, %v1171_v11  ;;  %61 = vmatprep.subr.mxu0 %v1158_v6  ;;  %v142_v24 = vand.u32 4294901760, %v1188_v17  ;;  %v148_v25 = vand.u32 4294901760, %v1193_v19  ;;  %v15_v2 = vld [vmem:[%s1475_s1 + $0x18] sm:$0xff] }
   0x7   :  { %v1209_v26 = vand.u32 4294901760, %v30_v21  ;;  %v1212_v27 = vsub.f32 %v16_v9, %v1173_v12  ;;  %63 = vmatpush1.msra.mxu0 %v1169_v10  ;;  %v154_v28 = vand.u32 4294901760, %v1197_v20  ;;  %v160_v29 = vand.u32 4294901760, %v1201_v22  ;;  %v14_v9 = vld [vmem:[%s1475_s1 + $0x10] sm:$0xff] }
   0x8   :  { %v166_v30 = vand.u32 4294901760, %v1204_v23  ;;  %v1219_v31 = vsub.f32 %v13_v13, %v1185_v16  ;;  %65 = vmatprep.subr.mxu0 %v1171_v11  ;;  %v143_v32 = vsub.f32 %v1188_v17, %v142_v24  ;;  %v149_v33 = vsub.f32 %v1193_v19, %v148_v25 }
   0x9   :  { %v1229_v34 = vsub.f32 %v30_v21, %v1209_v26  ;;  %v172_v35 = vand.u32 4294901760, %v1212_v27  ;;  %67 = vmatpush1.msra.mxu0 %v1173_v12  ;;  %v155_v36 = vsub.f32 %v1197_v20, %v154_v28  ;;  %v161_v37 = vsub.f32 %v1201_v22, %v160_v29 }
   0xa   :  { %v167_v38 = vsub.f32 %v1204_v23, %v166_v30  ;;  %v178_v39 = vand.u32 4294901760, %v1219_v31  ;;  %69 = vmatprep.subr.mxu0 %v1185_v16  ;;  %v144_v40 = vand.u32 4294901760, %v143_v32  ;;  %v150_v41 = vand.u32 4294901760, %v149_v33 }
   0xb   :  { %v1245_v42 = vand.u32 4294901760, %v1229_v34  ;;  %v173_v43 = vsub.f32 %v1212_v27, %v172_v35  ;;  %71 = vmatpush1.msra.mxu0 %v1190_v18  ;;  %v156_v44 = vand.u32 4294901760, %v155_v36  ;;  %v162_v45 = vand.u32 4294901760, %v161_v37 }
   0xc   :  { %v179_v46 = vsub.f32 %v1219_v31, %v178_v39  ;;  %145 = vmatprep.subr.mxu1 %v144_v40  ;;  %254 = vmatprep.subr.mxu0 %v1188_v17  ;;  %v168_v48 = vand.u32 4294901760, %v167_v38  ;;  %v1258_v49 = vsub.f32 %v12_v14, %v1190_v18  ;;  %v1297_v63 = vand.u32 4294901760, %v23_v58 }
   0xd   :  { %v108_v47 = vsub.f32 %v1229_v34, %v1245_v42  ;;  %151 = vmatpush1.msra.mxu1 %v150_v41  ;;  %v174_v50 = vand.u32 4294901760, %v173_v43  ;;  %v1305_v1 = vand.u32 4294901760, %v22_v60  ;;  %v1313_v7 = vand.u32 4294901760, %v19_v62 }
   0xe   :  { %157 = vmatprep.subr.mxu1 %v156_v44  ;;  %v180_v52 = vand.u32 4294901760, %v179_v46  ;;  %v184_v53 = vand.u32 4294901760, %v1258_v49  ;;  %v1316_v8 = vsub.f32 %v27_v56, %v1283_v59  ;;  %v1325_v13 = vsub.f32 %v26_v57, %v1290_v61 }
   0xf   :  { %v1260_v51 = vand.u32 4294901760, %v108_v47  ;;  %163 = vmatpush1.msra.mxu1 %v162_v45  ;;  %v1327_v14 = vand.u32 4294901760, %v18_v0  ;;  %v1332_v15 = vand.u32 4294901760, %v15_v2  ;;  %v1335_v17 = vsub.f32 %v23_v58, %v1297_v63 }
  0x10   :  { %169 = vmatprep.subr.mxu1 %v168_v48  ;;  %v185_v54 = vsub.f32 %v1258_v49, %v184_v53  ;;  %v685_v21 = vand.u32 4294901760, %v1316_v8 }
  0x11   :  { %110 = vmatmul.mubr.f32.vlgmr.msra.gmra.mxu0 %v1260_v51  ;;  %175 = vmatpush1.msra.mxu1 %v174_v50 }
  0x12   :  { %257 = vmatpush1.msra.mxu0 %v1193_v19  ;;  %181 = vmatprep.subr.mxu1 %v180_v52  ;;  %v186_v55 = vand.u32 4294901760, %v185_v54  ;;  %v1341_v19 = vsub.f32 %v22_v60, %v1305_v1 }
  0x13   :  { %260 = vmatprep.subr.mxu0 %v1197_v20  ;;  %308 = vmatprep.mubr.f32.mxu0 %v1127_v3  ;;  %v1343_v20 = vand.u32 4294901760, %v14_v9 }
  0x14   :  { %263 = vmatpush1.msra.mxu0 %v1201_v22  ;;  %187 = vmatpush1.msra.mxu1 %v186_v55  ;;  %v1350_v22 = vsub.f32 %v19_v62, %v1313_v7 }
  0x15   :  { %266 = vmatprep.subr.mxu0 %v1204_v23  ;;  %222 = vmatmul.mubr.f32.vlgmr.msra.gmra.mxu1 %v1209_v26  ;;  %v1356_v23 = vsub.f32 %v18_v0, %v1327_v14 }
  0x16   :  { %269 = vmatpush1.msra.mxu0 %v1212_v27  ;;  %342 = vmatprep.subr.mxu1 %v1154_v4  ;;  %v1362_v27 = vsub.f32 %v15_v2, %v1332_v15 }
  0x17   :  { %272 = vmatprep.subr.mxu0 %v1219_v31  ;;  %344 = vmatpush1.msra.mxu1 %v1156_v5  ;;  %v715_v31 = vand.u32 4294901760, %v1356_v23 }
  0x18   :  { %275 = vmatpush1.msra.mxu0 %v1258_v49  ;;  %346 = vmatprep.subr.mxu1 %v1158_v6  ;;  %v721_v32 = vand.u32 4294901760, %v1362_v27 }
  0x19   :  { %311 = vmatmul.mubr.f32.vlgmr.msra.gmra.mxu0 %v1229_v34  ;;  %426 = vmatprep.subr.mxu0 %v142_v24  ;;  %v691_v24 = vand.u32 4294901760, %v1325_v13  ;;  %v716_v36 = vsub.f32 %v1356_v23, %v715_v31 }
  0x1a   :  { %348 = vmatpush1.msra.mxu1 %v1169_v10  ;;  %430 = vmatpush1.msra.mxu0 %v148_v25  ;;  %v697_v25 = vand.u32 4294901760, %v1335_v17 }
  0x1b   :  { %350 = vmatprep.subr.mxu1 %v1171_v11  ;;  %434 = vmatprep.subr.mxu0 %v154_v28  ;;  %v1367_v28 = vsub.f32 %v14_v9, %v1343_v20  ;;  %v717_v40 = vand.u32 4294901760, %v716_v36 }
  0x1c   :  { %352 = vmatpush1.msra.mxu1 %v1173_v12  ;;  %438 = vmatpush1.msra.mxu0 %v160_v29  ;;  %v703_v29 = vand.u32 4294901760, %v1341_v19 }
  0x1d   :  { %354 = vmatprep.subr.mxu1 %v1185_v16  ;;  %442 = vmatprep.subr.mxu0 %v166_v30  ;;  %v709_v30 = vand.u32 4294901760, %v1350_v22  ;;  %v727_v33 = vand.u32 4294901760, %v1367_v28 }
  0x1e   :  { %356 = vmatpush1.msra.mxu1 %v1190_v18  ;;  %389 = vmatprep.mubr.f32.mxu1 %v1127_v3 }
  0x1f   :  { %446 = vmatpush1.msra.mxu0 %v172_v35  ;;  %393 = vmatmul.mubr.f32.vlgmr.msra.gmra.mxu1 %v1245_v42  ;;  %v710_v35 = vsub.f32 %v1350_v22, %v709_v30 }
  0x20   :  { %450 = vmatprep.subr.mxu0 %v178_v39  ;;  %520 = vmatprep.subr.mxu1 %v1154_v4  ;;  %v686_v4 = vsub.f32 %v1316_v8, %v685_v21 }
  0x21   :  { %454 = vmatpush1.msra.mxu0 %v184_v53  ;;  %487 = vmatprep.mubr.f32.mxu0 %v1127_v3  ;;  %v711_v39 = vand.u32 4294901760, %v710_v35 }
  0x22   :  { %522 = vmatpush1.msra.mxu1 %v1156_v5  ;;  %489 = vmatmul.mubr.f32.vlgmr.msra.gmra.mxu0 %v1209_v26  ;;  %v692_v5 = vsub.f32 %v1325_v13, %v691_v24 }
  0x23   :  { %524 = vmatprep.subr.mxu1 %v1158_v6  ;;  %600 = vmatprep.subr.mxu0 %v1283_v59  ;;  %v698_v6 = vsub.f32 %v1335_v17, %v697_v25 }
  0x24   :  { %526 = vmatpush1.msra.mxu1 %v1169_v10  ;;  %602 = vmatpush1.msra.mxu0 %v1290_v61  ;;  %v704_v10 = vsub.f32 %v1341_v19, %v703_v29 }
  0x25   :  { %528 = vmatprep.subr.mxu1 %v1171_v11  ;;  %604 = vmatprep.subr.mxu0 %v1297_v63  ;;  %v687_v11 = vand.u32 4294901760, %v686_v4  ;;  %v699_v37 = vand.u32 4294901760, %v698_v6 }
  0x26   :  { %530 = vmatpush1.msra.mxu1 %v1173_v12  ;;  %606 = vmatpush1.msra.mxu0 %v1305_v1  ;;  %v693_v12 = vand.u32 4294901760, %v692_v5  ;;  %v705_v38 = vand.u32 4294901760, %v704_v10 }
  0x27   :  { %532 = vmatprep.subr.mxu1 %v1185_v16  ;;  %608 = vmatprep.subr.mxu0 %v1313_v7  ;;  %v722_v16 = vsub.f32 %v1362_v27, %v721_v32 }
  0x28   :  { %534 = vmatpush1.msra.mxu1 %v1190_v18  ;;  %567 = vmatprep.mubr.f32.mxu1 %v1127_v3  ;;  %v728_v18 = vsub.f32 %v1367_v28, %v727_v33 }
  0x29   :  { %610 = vmatpush1.msra.mxu0 %v1327_v14  ;;  %569 = vmatmul.mubr.f32.vlgmr.msra.gmra.mxu1 %v1209_v26  ;;  %v723_v41 = vand.u32 4294901760, %v722_v16 }
  0x2a   :  { %612 = vmatprep.subr.mxu0 %v1332_v15  ;;  %688 = vmatprep.subr.mxu1 %v687_v11  ;;  %v729_v43 = vand.u32 4294901760, %v728_v18 }
  0x2b   :  { %614 = vmatpush1.msra.mxu0 %v1343_v20  ;;  %694 = vmatpush1.msra.mxu1 %v693_v12 }
  0x2c   :  { %647 = vmatprep.mubr.f32.mxu0 %v1127_v3  ;;  %700 = vmatprep.subr.mxu1 %v699_v37 }
  0x2d   :  { %797 = vmatprep.subr.mxu0 %v1316_v8  ;;  %653 = vmatmul.mubr.f32.vlgmr.msra.gmra.mxu0 %v1260_v51 }
  0x2e   :  { %706 = vmatpush1.msra.mxu1 %v705_v38  ;;  %800 = vmatpush1.msra.mxu0 %v1325_v13 }
  0x2f   :  { %712 = vmatprep.subr.mxu1 %v711_v39  ;;  %803 = vmatprep.subr.mxu0 %v1335_v17 }
  0x30   :  { %718 = vmatpush1.msra.mxu1 %v717_v40  ;;  %806 = vmatpush1.msra.mxu0 %v1341_v19 }
  0x31   :  { %724 = vmatprep.subr.mxu1 %v723_v41  ;;  %809 = vmatprep.subr.mxu0 %v1350_v22 }
  0x32   :  { %730 = vmatpush1.msra.mxu1 %v729_v43  ;;  %763 = vmatprep.mubr.f32.mxu1 %v1127_v3 }
  0x33   :  { %812 = vmatpush1.msra.mxu0 %v1356_v23  ;;  %765 = vmatmul.mubr.f32.vlgmr.msra.gmra.mxu1 %v1209_v26 }
  0x34   :  { %815 = vmatprep.subr.mxu0 %v1362_v27  ;;  %885 = vmatprep.subr.mxu1 %v1283_v59 }
  0x35   :  { %818 = vmatpush1.msra.mxu0 %v1367_v28  ;;  %851 = vmatprep.mubr.f32.mxu0 %v1127_v3 }
  0x36   :  { %887 = vmatpush1.msra.mxu1 %v1290_v61  ;;  %854 = vmatmul.mubr.f32.vlgmr.msra.gmra.mxu0 %v1229_v34 }
  0x37   :  { %889 = vmatprep.subr.mxu1 %v1297_v63  ;;  %969 = vmatprep.subr.mxu0 %v685_v21 }
  0x38   :  { %891 = vmatpush1.msra.mxu1 %v1305_v1  ;;  %973 = vmatpush1.msra.mxu0 %v691_v24 }
  0x39   :  { %893 = vmatprep.subr.mxu1 %v1313_v7  ;;  %977 = vmatprep.subr.mxu0 %v697_v25 }
  0x3a   :  { %895 = vmatpush1.msra.mxu1 %v1327_v14  ;;  %981 = vmatpush1.msra.mxu0 %v703_v29 }
  0x3b   :  { %897 = vmatprep.subr.mxu1 %v1332_v15  ;;  %985 = vmatprep.subr.mxu0 %v709_v30 }
  0x3c   :  { %899 = vmatpush1.msra.mxu1 %v1343_v20  ;;  %932 = vmatprep.mubr.f32.mxu1 %v1127_v3 }
  0x3d   :  { %989 = vmatpush1.msra.mxu0 %v715_v31  ;;  %936 = vmatmul.mubr.f32.vlgmr.msra.gmra.mxu1 %v1245_v42 }
  0x3e   :  { %993 = vmatprep.subr.mxu0 %v721_v32  ;;  %1063 = vmatprep.subr.mxu1 %v1283_v59 }
  0x3f   :  { %997 = vmatpush1.msra.mxu0 %v727_v33  ;;  %1030 = vmatprep.mubr.f32.mxu0 %v1127_v3 }
  0x40   :  { %1065 = vmatpush1.msra.mxu1 %v1290_v61  ;;  %1032 = vmatmul.mubr.f32.vlgmr.msra.gmra.mxu0 %v1209_v26 }
  0x41   :  { %1067 = vmatprep.subr.mxu1 %v1297_v63  ;;  %1110 = vmatprep.mubr.f32.mxu1 %v1127_v3 }
  0x42   :  { %1069 = vmatpush1.msra.mxu1 %v1305_v1 }
  0x43   :  { %1071 = vmatprep.subr.mxu1 %v1313_v7 }
  0x44   :  { %1073 = vmatpush1.msra.mxu1 %v1327_v14 }
  0x45   :  { %1075 = vmatprep.subr.mxu1 %v1332_v15 }
  0x46   :  { %1077 = vmatpush1.msra.mxu1 %v1343_v20 }
  0x47   :  { %1112 = vmatmul.mubr.f32.vlgmr.msra.gmra.mxu1 %v1209_v26 }
  0xd1   :  { %v111_v34 = vpop.f32.mrf.mxu0 }
  0xd3   :  { %v113_v42 = vpop.f32.mrf.mxu0 }
  0xd5   :  { %v223_v44 = vpop.f32.mrf.mxu1 }
  0xd6   :  { %v224_v47 = vadd.f32 %v223_v44, %v111_v34 }
  0xd7   :  { %v225_v45 = vpop.f32.mrf.mxu1 }
  0xd8   :  { %v226_v49 = vadd.f32 %v225_v45, %v113_v42 }
  0xd9   :  { %v312_v46 = vpop.f32.mrf.mxu0 }
  0xda   :  { %v313_v3 = vadd.f32 %v312_v46, %v224_v47 }
  0xdb   :  { %v314_v50 = vpop.f32.mrf.mxu0 }
  0xdc   :  { %v315_v53 = vadd.f32 %v314_v50, %v226_v49 }
  0xdf   :  { %v394_v48 = vpop.f32.mrf.mxu1 }
  0xe0   :  { %v395_v54 = vadd.f32 %v394_v48, %v313_v3 }
  0xe1   :  { %v396_v51 = vpop.f32.mrf.mxu1 }
  0xe2   :  { %v490_v52 = vpop.f32.mrf.mxu0  ;;  %v397_v55 = vadd.f32 %v396_v51, %v315_v53 }
  0xe3   :  { %v491_v57 = vadd.f32 %v490_v52, %v395_v54 }
  0xe4   :  { %v492_v56 = vpop.f32.mrf.mxu0 }
  0xe5   :  { %v493_v59 = vadd.f32 %v492_v56, %v397_v55 }
  0xe9   :  { %v570_v58 = vpop.f32.mrf.mxu1 }
  0xea   :  { %v571_v26 = vadd.f32 %v570_v58, %v491_v57 }
  0xeb   :  { %v572_v60 = vpop.f32.mrf.mxu1 }
  0xec   :  { %1118 = vst [vmem:[%s1477_s2] sm:$0xff] %v571_v26  ;;  %v573_v61 = vadd.f32 %v572_v60, %v493_v59 }
  0xed   :  { %v654_v62 = vpop.f32.mrf.mxu0 }
  0xee   :  { %1119 = vst [vmem:[%s1477_s2 + $0x8] sm:$0xff] %v573_v61 }
  0xef   :  { %v656_v63 = vpop.f32.mrf.mxu0 }
  0xf3   :  { %v766_v0 = vpop.f32.mrf.mxu1 }
  0xf4   :  { %v767_v7 = vadd.f32 %v766_v0, %v654_v62 }
  0xf5   :  { %v768_v1 = vpop.f32.mrf.mxu1 }
  0xf6   :  { %v855_v2 = vpop.f32.mrf.mxu0  ;;  %v769_v8 = vadd.f32 %v768_v1, %v656_v63 }
  0xf7   :  { %v856_v14 = vadd.f32 %v855_v2, %v767_v7 }
  0xf8   :  { %v857_v13 = vpop.f32.mrf.mxu0 }
  0xf9   :  { %v858_v19 = vadd.f32 %v857_v13, %v769_v8 }
  0xfd   :  { %v937_v9 = vpop.f32.mrf.mxu1 }
  0xfe   :  { %v938_v20 = vadd.f32 %v937_v9, %v856_v14 }
  0xff   :  { %v939_v15 = vpop.f32.mrf.mxu1 }
 0x100   :  { %v1033_v17 = vpop.f32.mrf.mxu0  ;;  %v940_v21 = vadd.f32 %v939_v15, %v858_v19 }
 0x101   :  { %v1034_v23 = vadd.f32 %v1033_v17, %v938_v20 }
 0x102   :  { %v1035_v22 = vpop.f32.mrf.mxu0 }
 0x103   :  { %v1036_v25 = vadd.f32 %v1035_v22, %v940_v21 }
 0x107   :  { %v1113_v24 = vpop.f32.mrf.mxu1 }
 0x108   :  { %v1114_v27 = vadd.f32 %v1113_v24, %v1034_v23 }
 0x109   :  { %v1115_v28 = vpop.f32.mrf.mxu1 }
 0x10a   :  { %1120 = vst [vmem:[%s1477_s2 + $0x10] sm:$0xff] %v1114_v27  ;;  %v1116_v29 = vadd.f32 %v1115_v28, %v1036_v25 }
 0x10c   :  { %1121 = vst [vmem:[%s1477_s2 + $0x18] sm:$0xff] %v1116_v29 }

</bundles_post_ra>
